<compile_context>
chip_gen: v6e
topology: v6e:2x2x1
jax: 0.10.0
libtpu: 0.0.40
codegen_flags: <defaults>
</compile_context>

<pallas_src>
import math

import jax
import jax.numpy as jnp
from jax.experimental import pallas as pl
from jax.experimental.pallas import tpu as pltpu

_MiB = 1 << 20
_LANE = 128
_SUBLANE = 8


def _copy_kernel(x_ref, o_ref):
    # Identity pass-through of the current block (HBM-bound; body is trivial).
    o_ref[...] = x_ref[...]


def _budgets():
    """(per-block byte budget, physical VMEM bytes), chip-aware."""
    try:
        phys = int(getattr(pltpu.get_tpu_info(), "vmem_capacity_bytes", 64 * _MiB))
    except Exception:  # no TPU info available at trace time
        phys = 64 * _MiB  # v7x per-TC floor; safe everywhere
    # Copy throughput plateaus by ~1 MiB blocks; 4 double-buffered tiles must
    # stay well under VMEM on every generation (incl. v7x 64 MiB).
    per_block = max(1 * _MiB, min(4 * _MiB, phys // 16))
    return per_block, phys


def _pick_slab(total):
    """Widest lane-dense (rows, cols) factorization: cols%128==0, rows%8==0."""
    for cols in (8192, 4096, 2048, 1024, 512, 256, 128):
        if total % cols == 0:
            rows = total // cols
            if rows % _SUBLANE == 0:
                return rows, cols
    return None


def _pick_tile_rows(rows, cols, itemsize, block_budget):
    """Largest multiple-of-8 divisor of `rows` whose block fits the budget.

    Single step when it fits (best on single-TC v5e/v6e); when >1 step is
    required, prefer an even step count so v7x megacore splits evenly.
    """
    max_rows = max(_SUBLANE,
                   (block_budget // (cols * itemsize)) // _SUBLANE * _SUBLANE)
    tile = min(rows, max_rows)
    tile = max(_SUBLANE, (tile // _SUBLANE) * _SUBLANE)
    while rows % tile:
        tile -= _SUBLANE
    steps = rows // tile
    if steps > 1 and steps % 2 == 1:
        t = tile
        while t >= _SUBLANE:
            if rows % t == 0 and (rows // t) % 2 == 0:
                tile = t
                break
            t -= _SUBLANE
    return tile


def _leading_axis_tile(B, F, itemsize, block_budget):
    """Fallback when total isn't (8,128)-factorizable: tile the leading axis.

    Block = (tile_b, F) with a full-extent last dim is always legal; tile_b is
    either B itself or a multiple-of-8 divisor of B, keeping peak VMEM bounded.
    """
    if B * F * itemsize <= block_budget:
        return B
    divs = [d for d in range(_SUBLANE, B, _SUBLANE) if B % d == 0]
    fits = [d for d in divs if d * F * itemsize <= block_budget]
    if fits:
        return max(fits)
    if divs:
        return min(divs)
    return B  # no legal smaller tile exists; single (bounded) block


def _unflatten_pallas(x, out_shape):
    """Framework-parity identity copy through a Pallas kernel."""
    B = x.shape[0]
    F = math.prod(x.shape[1:]) if x.ndim > 1 else 1
    total = B * F
    itemsize = jnp.dtype(x.dtype).itemsize
    block_budget, phys = _budgets()

    slab = _pick_slab(total)
    if slab is not None:
        rows, cols = slab
        tile = _pick_tile_rows(rows, cols, itemsize, block_budget)
    else:
        rows, cols = B, F
        tile = _leading_axis_tile(B, F, itemsize, block_budget)

    x2 = jnp.reshape(x, (rows, cols))  # metadata-only re-presentation
    block_bytes = tile * cols * itemsize
    vmem_limit = int(min(phys, max(8 * _MiB, 6 * block_bytes)))

    flat = pl.pallas_call(
        _copy_kernel,
        out_shape=jax.ShapeDtypeStruct((rows, cols), x.dtype),
        grid=(rows // tile,),
        in_specs=[pl.BlockSpec((tile, cols), lambda i: (i, 0))],
        out_specs=pl.BlockSpec((tile, cols), lambda i: (i, 0)),
        input_output_aliases={0: 0},  # reuse the slab's HBM buffer for output
        compiler_params=pltpu.CompilerParams(
            dimension_semantics=("parallel",),
            vmem_limit_bytes=vmem_limit,
        ),
        cost_estimate=pl.CostEstimate(
            flops=0, transcendentals=0, bytes_accessed=2 * total * itemsize),
    )(x2)

    return jnp.reshape(flat, out_shape)


def unflatten(x, size, *, use_pallas=False):
    """Equivalent of UnFlatten(size): x.view(B, *size).

    Default path is the honest one: a metadata-only jnp.reshape (zero bytes
    moved).  `use_pallas=True` routes through the parity identity kernel.
    """
    B = x.shape[0]
    F = math.prod(x.shape[1:]) if x.ndim > 1 else 1
    tgt = math.prod(size)
    assert tgt == F, f"prod(size)={tgt} must equal flattened dim {F}"
    if not use_pallas:
        return jnp.reshape(x, (B, *size))
    return _unflatten_pallas(x, (B, *size))


if __name__ == "__main__":
    key = jax.random.PRNGKey(0)
    B = 2
    size = (4, 16, 16)            # target per-example shape (C, H, W)
    F = math.prod(size)

    x = jax.random.normal(key, (B, F), dtype=jnp.float32)
    ref = jax.block_until_ready(jnp.reshape(x, (B, *size)))

    # Hot path (zero bytes moved).
    y_view = jax.block_until_ready(unflatten(x, size))
    # Parity path: run the Pallas kernel once.
    y_pallas = jax.block_until_ready(unflatten(x, size, use_pallas=True))

    assert y_view.shape == (B, *size), y_view.shape
    assert y_pallas.shape == (B, *size), y_pallas.shape
    assert y_view.dtype == x.dtype and y_pallas.dtype == x.dtype
    assert jnp.array_equal(y_view, ref), "reshape path mismatch"
    assert jnp.array_equal(y_pallas, ref), "pallas path mismatch vs reference"

    print("KERNEL_OK")
</pallas_src>

<mosaic_0001>
module attributes {stable_mosaic.version = 11 : i64} {
  func.func @_copy_kernel(%arg0: i32, %arg1: memref<8x256xf32, #tpu.memory_space<vmem>>, %arg2: memref<8x256xf32, #tpu.memory_space<vmem>>) attributes {dimension_semantics = [#tpu.dimension_semantics<parallel>], iteration_bounds = array<i64: 1>, scalar_prefetch = 0 : i64, scratch_operands = 0 : i64, tpu.core_type = #tpu.core_type<tc>, window_params = [{transform_indices = @transform_0, window_bounds = array<i64: 8, 256>}, {transform_indices = @transform_1, window_bounds = array<i64: 8, 256>}]} {
    %c0 = arith.constant 0 : index
    %c0_0 = arith.constant 0 : index
    %0 = vector.load %arg1[%c0, %c0_0] : memref<8x256xf32, #tpu.memory_space<vmem>>, vector<8x256xf32>
    %c0_1 = arith.constant 0 : index
    %c0_2 = arith.constant 0 : index
    %1 = vector.load %arg2[%c0_1, %c0_2] : memref<8x256xf32, #tpu.memory_space<vmem>>, vector<8x256xf32>
    tpu.vector_store %arg2[%c0_1, %c0_2], %0 {strides = array<i32>} : memref<8x256xf32, #tpu.memory_space<vmem>>, vector<8x256xf32>,
    return
  }
  func.func @transform_0(%arg0: i32) -> (i32, i32) {
    %c0_i32 = arith.constant 0 : i32
    %c0_i32_0 = arith.constant 0 : i32
    return %arg0, %c0_i32 : i32, i32
  }
  func.func @transform_1(%arg0: i32) -> (i32, i32) {
    %c0_i32 = arith.constant 0 : i32
    %c0_i32_0 = arith.constant 0 : i32
    return %arg0, %c0_i32 : i32, i32
  }
}

</mosaic_0001>

<bundles_post_ra>
// kernel: tpu_custom_call.1
= control target key start
LH: loop header
LB: loop body
LE: loop exit
PB: predicated region body
PF: predicated region fallthrough
CT: control target
= control target key end

     0   :  { %6 = vsyncpa [#allocation3], 0  ;;  %s104_s0 = inlined_call_operand.hbm [shape: f32[8,256], index: 0, kind: input, shape index: {}, may-alias: {0,1}]   ;;  %s105_s1 = inlined_call_operand.hbm [shape: f32[8,256], index: 1, kind: output, shape index: {}, may-alias: {0,1}]  }
   0x1   :  { %7 = vsyncpa [#allocation4], 0  ;;  %s86_s6 = smov [#allocation2]  }
   0x2   :  { %s14_s7 = sshll.u32 %s86_s6, 4  ;;  %s15_s7 = int_to_ptr.vmem [resolvable:$true] %s14_s7 }
   0x3   :  { %s50_s8 = scalar_lea.vmem %s15_s7, 256  ;;  %p55_p1 = scmp.lt.s32.totalorder %s15_s7, %s15_s7 }
   0x4   :  { %p51_p0 = scmp.ne.s32.totalorder %s15_s7, %s50_s8  ;;  %p56_p2 = scmp.lt.s32.totalorder %s50_s8, %s50_s8 }
   0x6   :  { %p57_p3 = por %p56_p2, %p55_p1 }
   0x8   :  { %p58_p4 = pnand %p57_p3, %p51_p0 }
   0xa   :  { %61 = shalt.err (!%p58_p4)
}
   0xb   :  { %17 = dma.hbm_to_vmem [thread:$0]  %s104_s0, 256, %s15_s7, [#allocation3]  }
   0xc   :  { %82 = dma.done.wait [#allocation3], 256  }
   0xd   :  { %83 = vsyncadd [#allocation3], 4294967040  ;;  %s87_s11 = smov [#allocation5]   ;;  %v21_v0 = vld [vmem:[#allocation2] sm:$0xff]  ;;  %v22_v1 = vld [vmem:[#allocation2 + $0x8] sm:$0xff] }
   0xe   :  { %s31_s12 = sshll.u32 %s87_s11, 4  ;;  %23 = vst [vmem:[#allocation5] sm:$0xff] %v21_v0  ;;  %24 = vst [vmem:[#allocation5 + $0x8] sm:$0xff] %v22_v1  ;;  %s32_s12 = int_to_ptr.vmem [resolvable:$true] %s31_s12 }
   0xf   :  { %s62_s13 = scalar_lea.vmem %s32_s12, 256  ;;  %p67_p6 = scmp.lt.s32.totalorder %s32_s12, %s32_s12 }
  0x10   :  { %p63_p5 = scmp.ne.s32.totalorder %s32_s12, %s62_s13  ;;  %p68_p7 = scmp.lt.s32.totalorder %s62_s13, %s62_s13 }
  0x12   :  { %p69_p8 = por %p68_p7, %p67_p6 }
  0x14   :  { %p70_p9 = pnand %p69_p8, %p63_p5 }
  0x16   :  { %73 = shalt.err (!%p70_p9)
}
  0x17   :  { %34 = dma.vmem_to_hbm [thread:$0]  %s32_s12, 256, %s105_s1, [#allocation4]  }
  0x18   :  { %84 = dma.done.wait [#allocation4], 256  }
  0x19   :  { %85 = vsyncadd [#allocation4], 4294967040 }
  0x1a   :  { %38 = vsyncpa [#allocation3], 1 }
  0x1b   :  { %39 = vsyncpa [#allocation4], 1 }

</bundles_post_ra>
